<compile_context>
chip_gen: v7x
topology: tpu7x:2x2x1
jax: 0.10.0
libtpu: 0.0.40
codegen_flags: <defaults>
</compile_context>

<pallas_src>
import jax
import jax.numpy as jnp
import numpy as np
from jax import lax
from jax.experimental import pallas as pl
from jax.experimental.pallas import tpu as pltpu

# ----------------------------- config ---------------------------------------
B = 2       # batch
T = 8       # source sequence length
H = 32      # transformer_encoder_hidden
F = 32      # variance_predictor_filter_size
K = 3       # variance_predictor_kernel_size (pad = (K-1)//2 == 1 == conv2 pad)
LN_EPS = 1e-5

BT = B * T
OUT_LANES = 128         # lane-dense padded output width

# Static position masks (trace-time constants): does a position have a
# previous / next frame inside its own sequence?
_POS = np.arange(BT) % T
_MPREV = (_POS > 0).astype(np.float32).reshape(BT, 1)
_MNEXT = (_POS < T - 1).astype(np.float32).reshape(BT, 1)

_FLOPS = 2 * BT * (K * H * F + K * F * F + F * OUT_LANES)
_BYTES = (BT * H * 4 + BT * 3 * 4 + (K * H + K * F) * F * 2
          + F * OUT_LANES * 2 + 8 * OUT_LANES * 4 + BT * OUT_LANES * 4)

_VMEM = pl.BlockSpec(memory_space=pltpu.MemorySpace.VMEM)


# ----------------------- fused VariancePredictor kernel ----------------------
def _vp_kernel(x_ref, m_ref, wconv_ref, wlin_ref, vecs_ref, out_ref):
    f32, bf16 = jnp.float32, jnp.bfloat16

    keep = m_ref[:, 0:1]      # (BT,1)  1.0 = not padded (masked_fill keep)
    mprev = m_ref[:, 1:2]     # (BT,1)  1.0 = has a previous frame in-sequence
    mnext = m_ref[:, 2:3]     # (BT,1)  1.0 = has a next frame in-sequence

    b1, g1, be1 = vecs_ref[0:1, :F], vecs_ref[1:2, :F], vecs_ref[2:3, :F]
    b2, g2, be2 = vecs_ref[3:4, :F], vecs_ref[4:5, :F], vecs_ref[5:6, :F]
    blin = vecs_ref[7:8, :]   # (1, OUT_LANES) lane-splatted Linear bias

    def conv3(v, row0, cin, bias):
        # 'same'-padded K=3 Conv1d over the flattened (B*T, cin) activations as
        # three accumulated MXU matmuls.  pltpu.roll builds the +-1 taps and the
        # static masks zero the sequence (and batch) edges.
        prev = pltpu.roll(v, 1, 0) * mprev        # row i <- row i-1
        nxt = pltpu.roll(v, BT - 1, 0) * mnext    # row i <- row i+1
        w0 = wconv_ref[row0:row0 + cin, :]
        w1 = wconv_ref[row0 + cin:row0 + 2 * cin, :]
        w2 = wconv_ref[row0 + 2 * cin:row0 + 3 * cin, :]
        return (jnp.dot(prev.astype(bf16), w0, preferred_element_type=f32)
                + jnp.dot(v.astype(bf16), w1, preferred_element_type=f32)
                + jnp.dot(nxt.astype(bf16), w2, preferred_element_type=f32)
                + bias)

    def relu_ln(v, g, be):    # ReLU -> LayerNorm in f32 (v5e-safe); Dropout = id
        v = jnp.maximum(v, 0.0)
        mu = jnp.mean(v, axis=-1, keepdims=True)
        var = jnp.mean((v - mu) ** 2, axis=-1, keepdims=True)
        return (v - mu) * lax.rsqrt(var + LN_EPS) * g + be

    x = x_ref[...]                                     # (BT, H) f32
    h = relu_ln(conv3(x, 0, H, b1), g1, be1)           # Conv block 1
    h = relu_ln(conv3(h, K * H, F, b2), g2, be2)       # Conv block 2

    # Linear(F -> 1) as a lane-padded matmul -> full unmasked (BT, 128) store.
    # masked_fill(mask, 0.0) == multiply by keep (applied after the bias).
    p = jnp.dot(h.astype(bf16), wlin_ref[...], preferred_element_type=f32) + blin
    out_ref[...] = p * keep


def variance_predictor(packed, x, src_mask):
    """x: (B, T, H) f32, src_mask: (B, T) bool (True = padded) -> (B, T) f32."""
    x2d = x.reshape(BT, H)                                     # free reshape
    keep = jnp.logical_not(src_mask).reshape(BT, 1).astype(jnp.float32)
    masks = jnp.concatenate(
        [keep, jnp.asarray(_MPREV), jnp.asarray(_MNEXT)], axis=1)   # (BT, 3)
    out = pl.pallas_call(
        _vp_kernel,
        out_shape=jax.ShapeDtypeStruct((BT, OUT_LANES), jnp.float32),
        in_specs=[_VMEM, _VMEM, _VMEM, _VMEM, _VMEM],
        out_specs=_VMEM,
        cost_estimate=pl.CostEstimate(
            flops=_FLOPS, transcendentals=0, bytes_accessed=_BYTES),
        # No grid: the whole problem is a few KB, so a single invocation avoids
        # per-grid-step pipeline/DMA overhead.
    )(x2d, masks, packed["wconv"], packed["wlin"], packed["vecs"])
    return out[:, 0].reshape(B, T)


# ------------------------------ parameters -----------------------------------
def init_raw_params(key):
    ks = jax.random.split(key, 6)
    return {
        "W1": 0.1 * jax.random.normal(ks[0], (F, H, K), jnp.float32),  # torch Conv1d (out,in,K)
        "b1": 0.1 * jax.random.normal(ks[1], (F,), jnp.float32),
        "W2": 0.1 * jax.random.normal(ks[2], (F, F, K), jnp.float32),
        "b2": 0.1 * jax.random.normal(ks[3], (F,), jnp.float32),
        "WL": 0.1 * jax.random.normal(ks[4], (1, F), jnp.float32),     # torch Linear (out,in)
        "bL": 0.1 * jax.random.normal(ks[5], (1,), jnp.float32),
        # nn.LayerNorm affine parameters at their defaults
        "g1": jnp.ones((F,), jnp.float32), "be1": jnp.zeros((F,), jnp.float32),
        "g2": jnp.ones((F,), jnp.float32), "be2": jnp.zeros((F,), jnp.float32),
    }


def pack_params(raw):
    # Per-tap weight layout: rows [k*C_in + c], cols f  <->  torch W[f, c, k];
    # tap k pairs with input x[t + k - 1] (k=0 prev, k=1 center, k=2 next).
    w1t = jnp.transpose(raw["W1"], (2, 1, 0)).reshape(K * H, F)     # (96, 32)
    w2t = jnp.transpose(raw["W2"], (2, 1, 0)).reshape(K * F, F)     # (96, 32)
    wconv = jnp.concatenate([w1t, w2t], axis=0).astype(jnp.bfloat16)  # (192, 32)
    # Linear weight zero-padded to 128 lanes (column 0 is the real output).
    wlin = (jnp.zeros((F, OUT_LANES), jnp.float32)
            .at[:, 0].set(raw["WL"][0]).astype(jnp.bfloat16))
    # LayerNorm / bias vectors + lane-splatted linear bias, kept in f32.
    vecs = jnp.zeros((8, OUT_LANES), jnp.float32)
    vecs = vecs.at[0, :F].set(raw["b1"])
    vecs = vecs.at[1, :F].set(raw["g1"])
    vecs = vecs.at[2, :F].set(raw["be1"])
    vecs = vecs.at[3, :F].set(raw["b2"])
    vecs = vecs.at[4, :F].set(raw["g2"])
    vecs = vecs.at[5, :F].set(raw["be2"])
    vecs = vecs.at[7, :].set(raw["bL"][0])
    return {"wconv": wconv, "wlin": wlin, "vecs": vecs}


# --------------------------- pure-JAX reference ------------------------------
def variance_predictor_reference(raw, x, src_mask):
    def conv1d(inp, W, b, padding):
        Tn = inp.shape[1]
        xp = jnp.pad(inp, ((0, 0), (padding, padding), (0, 0)))
        acc = sum(jnp.einsum("btc,fc->btf", xp[:, k:k + Tn, :], W[:, :, k])
                  for k in range(W.shape[2]))
        return acc + b

    def layer_norm(v, g, be):
        mu = jnp.mean(v, -1, keepdims=True)
        var = jnp.mean((v - mu) ** 2, -1, keepdims=True)
        return (v - mu) / jnp.sqrt(var + LN_EPS) * g + be

    h = layer_norm(jax.nn.relu(conv1d(x, raw["W1"], raw["b1"], (K - 1) // 2)),
                   raw["g1"], raw["be1"])
    h = layer_norm(jax.nn.relu(conv1d(h, raw["W2"], raw["b2"], 1)),
                   raw["g2"], raw["be2"])
    p = jnp.einsum("btf,of->bt", h, raw["WL"]) + raw["bL"][0]
    return jnp.where(src_mask, 0.0, p)


# --------------------------------- main --------------------------------------
if __name__ == "__main__":
    key = jax.random.PRNGKey(0)
    k_param, k_x = jax.random.split(key)
    raw = init_raw_params(k_param)
    packed = pack_params(raw)

    x = jax.random.normal(k_x, (B, T, H), jnp.float32)
    lengths = jnp.array([8, 6], jnp.int32)
    src_mask = jnp.arange(T)[None, :] >= lengths[:, None]     # (B, T) bool, True = padded

    run = jax.jit(variance_predictor)
    out = run(packed, x, src_mask)
    jax.block_until_ready(out)

    ref = variance_predictor_reference(raw, x, src_mask)

    assert out.shape == (B, T)
    assert bool(jnp.all(out * src_mask == 0.0))               # masked_fill(mask, 0.0)
    err = float(jnp.max(jnp.abs(out - ref)))
    # bf16 MXU operands with f32 accumulation -> relaxed tolerance vs f32 ref.
    assert jnp.allclose(out, ref, atol=2e-2, rtol=2e-2), err

    print("KERNEL_OK")
</pallas_src>

<mosaic_0001>
module attributes {stable_mosaic.version = 11 : i64} {
  func.func @_vp_kernel(%arg0: memref<16x32xf32, #tpu.memory_space<vmem>>, %arg1: memref<16x3xf32, #tpu.memory_space<vmem>>, %arg2: memref<192x32xbf16, #tpu.memory_space<vmem>>, %arg3: memref<32x128xbf16, #tpu.memory_space<vmem>>, %arg4: memref<8x128xf32, #tpu.memory_space<vmem>>, %arg5: memref<16x128xf32, #tpu.memory_space<vmem>>) attributes {dimension_semantics = [], scalar_prefetch = 0 : i64, scratch_operands = 0 : i64, tpu.core_type = #tpu.core_type<tc>} {
    %c0 = arith.constant 0 : index
    %c0_0 = arith.constant 0 : index
    %0 = vector.load %arg1[%c0, %c0_0] : memref<16x3xf32, #tpu.memory_space<vmem>>, vector<16x1xf32>
    %c0_1 = arith.constant 0 : index
    %c1 = arith.constant 1 : index
    %1 = vector.load %arg1[%c0_1, %c1] : memref<16x3xf32, #tpu.memory_space<vmem>>, vector<16x1xf32>
    %c0_2 = arith.constant 0 : index
    %c2 = arith.constant 2 : index
    %2 = vector.load %arg1[%c0_2, %c2] : memref<16x3xf32, #tpu.memory_space<vmem>>, vector<16x1xf32>
    %c0_3 = arith.constant 0 : index
    %c0_4 = arith.constant 0 : index
    %3 = vector.load %arg4[%c0_3, %c0_4] : memref<8x128xf32, #tpu.memory_space<vmem>>, vector<1x32xf32>
    %c1_5 = arith.constant 1 : index
    %c0_6 = arith.constant 0 : index
    %4 = vector.load %arg4[%c1_5, %c0_6] : memref<8x128xf32, #tpu.memory_space<vmem>>, vector<1x32xf32>
    %c2_7 = arith.constant 2 : index
    %c0_8 = arith.constant 0 : index
    %5 = vector.load %arg4[%c2_7, %c0_8] : memref<8x128xf32, #tpu.memory_space<vmem>>, vector<1x32xf32>
    %c3 = arith.constant 3 : index
    %c0_9 = arith.constant 0 : index
    %6 = vector.load %arg4[%c3, %c0_9] : memref<8x128xf32, #tpu.memory_space<vmem>>, vector<1x32xf32>
    %c4 = arith.constant 4 : index
    %c0_10 = arith.constant 0 : index
    %7 = vector.load %arg4[%c4, %c0_10] : memref<8x128xf32, #tpu.memory_space<vmem>>, vector<1x32xf32>
    %c5 = arith.constant 5 : index
    %c0_11 = arith.constant 0 : index
    %8 = vector.load %arg4[%c5, %c0_11] : memref<8x128xf32, #tpu.memory_space<vmem>>, vector<1x32xf32>
    %c7 = arith.constant 7 : index
    %c0_12 = arith.constant 0 : index
    %9 = vector.load %arg4[%c7, %c0_12] : memref<8x128xf32, #tpu.memory_space<vmem>>, vector<1x128xf32>
    %c0_13 = arith.constant 0 : index
    %c0_14 = arith.constant 0 : index
    %10 = vector.load %arg0[%c0_13, %c0_14] : memref<16x32xf32, #tpu.memory_space<vmem>>, vector<16x32xf32>
    %c1_i32 = arith.constant 1 : i32
    %11 = tpu.dynamic_rotate %10 by %c1_i32 dim 0 : vector<16x32xf32>, i32 -> vector<16x32xf32>
    %12 = vector.broadcast %1 : vector<16x1xf32> to vector<16x32xf32>
    %13 = arith.mulf %11, %12 : vector<16x32xf32>
    %c15_i32 = arith.constant 15 : i32
    %14 = tpu.dynamic_rotate %10 by %c15_i32 dim 0 : vector<16x32xf32>, i32 -> vector<16x32xf32>
    %15 = vector.broadcast %2 : vector<16x1xf32> to vector<16x32xf32>
    %16 = arith.mulf %14, %15 : vector<16x32xf32>
    %c0_15 = arith.constant 0 : index
    %c0_16 = arith.constant 0 : index
    %17 = vector.load %arg2[%c0_15, %c0_16] : memref<192x32xbf16, #tpu.memory_space<vmem>>, vector<32x32xbf16>
    %c32 = arith.constant 32 : index
    %c0_17 = arith.constant 0 : index
    %18 = vector.load %arg2[%c32, %c0_17] : memref<192x32xbf16, #tpu.memory_space<vmem>>, vector<32x32xbf16>
    %c64 = arith.constant 64 : index
    %c0_18 = arith.constant 0 : index
    %19 = vector.load %arg2[%c64, %c0_18] : memref<192x32xbf16, #tpu.memory_space<vmem>>, vector<32x32xbf16>
    %20 = arith.truncf %13 : vector<16x32xf32> to vector<16x32xbf16>
    %cst = arith.constant dense<0.000000e+00> : vector<16x32xf32>
    %21 = tpu.matmul %20, %17, %cst {dimension_numbers = #tpu.dot_dimension_numbers<[1], [0], [0], [1], [0, 0, 1, 1], [], []>} : vector<16x32xbf16>, vector<32x32xbf16>, vector<16x32xf32> -> vector<16x32xf32>
    %22 = arith.truncf %10 : vector<16x32xf32> to vector<16x32xbf16>
    %cst_19 = arith.constant dense<0.000000e+00> : vector<16x32xf32>
    %23 = tpu.matmul %22, %18, %cst_19 {dimension_numbers = #tpu.dot_dimension_numbers<[1], [0], [0], [1], [0, 0, 1, 1], [], []>} : vector<16x32xbf16>, vector<32x32xbf16>, vector<16x32xf32> -> vector<16x32xf32>
    %24 = arith.addf %21, %23 : vector<16x32xf32>
    %25 = arith.truncf %16 : vector<16x32xf32> to vector<16x32xbf16>
    %cst_20 = arith.constant dense<0.000000e+00> : vector<16x32xf32>
    %26 = tpu.matmul %25, %19, %cst_20 {dimension_numbers = #tpu.dot_dimension_numbers<[1], [0], [0], [1], [0, 0, 1, 1], [], []>} : vector<16x32xbf16>, vector<32x32xbf16>, vector<16x32xf32> -> vector<16x32xf32>
    %27 = arith.addf %24, %26 : vector<16x32xf32>
    %28 = vector.broadcast %3 : vector<1x32xf32> to vector<16x32xf32>
    %29 = arith.addf %27, %28 : vector<16x32xf32>
    %cst_21 = arith.constant 0.000000e+00 : f32
    %30 = vector.broadcast %cst_21 : f32 to vector<16x32xf32>
    %31 = arith.maximumf %29, %30 : vector<16x32xf32>
    %cst_22 = arith.constant dense<0.000000e+00> : vector<16xf32>
    %32 = vector.multi_reduction <add>, %31, %cst_22 [1] : vector<16x32xf32> to vector<16xf32>
    %33 = vector.shape_cast %32 : vector<16xf32> to vector<16x1xf32>
    %cst_23 = arith.constant 3.200000e+01 : f32
    %34 = vector.broadcast %cst_23 : f32 to vector<16x1xf32>
    %35 = arith.divf %33, %34 : vector<16x1xf32>
    %36 = vector.broadcast %35 : vector<16x1xf32> to vector<16x32xf32>
    %37 = arith.subf %31, %36 : vector<16x32xf32>
    %38 = arith.mulf %37, %37 : vector<16x32xf32>
    %cst_24 = arith.constant dense<0.000000e+00> : vector<16xf32>
    %39 = vector.multi_reduction <add>, %38, %cst_24 [1] : vector<16x32xf32> to vector<16xf32>
    %40 = vector.shape_cast %39 : vector<16xf32> to vector<16x1xf32>
    %cst_25 = arith.constant 3.200000e+01 : f32
    %41 = vector.broadcast %cst_25 : f32 to vector<16x1xf32>
    %42 = arith.divf %40, %41 : vector<16x1xf32>
    %43 = vector.broadcast %35 : vector<16x1xf32> to vector<16x32xf32>
    %44 = arith.subf %31, %43 : vector<16x32xf32>
    %cst_26 = arith.constant 9.99999974E-6 : f32
    %45 = vector.broadcast %cst_26 : f32 to vector<16x1xf32>
    %46 = arith.addf %42, %45 : vector<16x1xf32>
    %47 = math.rsqrt %46 : vector<16x1xf32>
    %48 = vector.broadcast %47 : vector<16x1xf32> to vector<16x32xf32>
    %49 = arith.mulf %44, %48 : vector<16x32xf32>
    %50 = vector.broadcast %4 : vector<1x32xf32> to vector<16x32xf32>
    %51 = arith.mulf %49, %50 : vector<16x32xf32>
    %52 = vector.broadcast %5 : vector<1x32xf32> to vector<16x32xf32>
    %53 = arith.addf %51, %52 : vector<16x32xf32>
    %c1_i32_27 = arith.constant 1 : i32
    %54 = tpu.dynamic_rotate %53 by %c1_i32_27 dim 0 : vector<16x32xf32>, i32 -> vector<16x32xf32>
    %55 = vector.broadcast %1 : vector<16x1xf32> to vector<16x32xf32>
    %56 = arith.mulf %54, %55 : vector<16x32xf32>
    %c15_i32_28 = arith.constant 15 : i32
    %57 = tpu.dynamic_rotate %53 by %c15_i32_28 dim 0 : vector<16x32xf32>, i32 -> vector<16x32xf32>
    %58 = vector.broadcast %2 : vector<16x1xf32> to vector<16x32xf32>
    %59 = arith.mulf %57, %58 : vector<16x32xf32>
    %c96 = arith.constant 96 : index
    %c0_29 = arith.constant 0 : index
    %60 = vector.load %arg2[%c96, %c0_29] : memref<192x32xbf16, #tpu.memory_space<vmem>>, vector<32x32xbf16>
    %c128 = arith.constant 128 : index
    %c0_30 = arith.constant 0 : index
    %61 = vector.load %arg2[%c128, %c0_30] : memref<192x32xbf16, #tpu.memory_space<vmem>>, vector<32x32xbf16>
    %c160 = arith.constant 160 : index
    %c0_31 = arith.constant 0 : index
    %62 = vector.load %arg2[%c160, %c0_31] : memref<192x32xbf16, #tpu.memory_space<vmem>>, vector<32x32xbf16>
    %63 = arith.truncf %56 : vector<16x32xf32> to vector<16x32xbf16>
    %cst_32 = arith.constant dense<0.000000e+00> : vector<16x32xf32>
    %64 = tpu.matmul %63, %60, %cst_32 {dimension_numbers = #tpu.dot_dimension_numbers<[1], [0], [0], [1], [0, 0, 1, 1], [], []>} : vector<16x32xbf16>, vector<32x32xbf16>, vector<16x32xf32> -> vector<16x32xf32>
    %65 = arith.truncf %53 : vector<16x32xf32> to vector<16x32xbf16>
    %cst_33 = arith.constant dense<0.000000e+00> : vector<16x32xf32>
    %66 = tpu.matmul %65, %61, %cst_33 {dimension_numbers = #tpu.dot_dimension_numbers<[1], [0], [0], [1], [0, 0, 1, 1], [], []>} : vector<16x32xbf16>, vector<32x32xbf16>, vector<16x32xf32> -> vector<16x32xf32>
    %67 = arith.addf %64, %66 : vector<16x32xf32>
    %68 = arith.truncf %59 : vector<16x32xf32> to vector<16x32xbf16>
    %cst_34 = arith.constant dense<0.000000e+00> : vector<16x32xf32>
    %69 = tpu.matmul %68, %62, %cst_34 {dimension_numbers = #tpu.dot_dimension_numbers<[1], [0], [0], [1], [0, 0, 1, 1], [], []>} : vector<16x32xbf16>, vector<32x32xbf16>, vector<16x32xf32> -> vector<16x32xf32>
    %70 = arith.addf %67, %69 : vector<16x32xf32>
    %71 = vector.broadcast %6 : vector<1x32xf32> to vector<16x32xf32>
    %72 = arith.addf %70, %71 : vector<16x32xf32>
    %cst_35 = arith.constant 0.000000e+00 : f32
    %73 = vector.broadcast %cst_35 : f32 to vector<16x32xf32>
    %74 = arith.maximumf %72, %73 : vector<16x32xf32>
    %cst_36 = arith.constant dense<0.000000e+00> : vector<16xf32>
    %75 = vector.multi_reduction <add>, %74, %cst_36 [1] : vector<16x32xf32> to vector<16xf32>
    %76 = vector.shape_cast %75 : vector<16xf32> to vector<16x1xf32>
    %cst_37 = arith.constant 3.200000e+01 : f32
    %77 = vector.broadcast %cst_37 : f32 to vector<16x1xf32>
    %78 = arith.divf %76, %77 : vector<16x1xf32>
    %79 = vector.broadcast %78 : vector<16x1xf32> to vector<16x32xf32>
    %80 = arith.subf %74, %79 : vector<16x32xf32>
    %81 = arith.mulf %80, %80 : vector<16x32xf32>
    %cst_38 = arith.constant dense<0.000000e+00> : vector<16xf32>
    %82 = vector.multi_reduction <add>, %81, %cst_38 [1] : vector<16x32xf32> to vector<16xf32>
    %83 = vector.shape_cast %82 : vector<16xf32> to vector<16x1xf32>
    %cst_39 = arith.constant 3.200000e+01 : f32
    %84 = vector.broadcast %cst_39 : f32 to vector<16x1xf32>
    %85 = arith.divf %83, %84 : vector<16x1xf32>
    %86 = vector.broadcast %78 : vector<16x1xf32> to vector<16x32xf32>
    %87 = arith.subf %74, %86 : vector<16x32xf32>
    %cst_40 = arith.constant 9.99999974E-6 : f32
    %88 = vector.broadcast %cst_40 : f32 to vector<16x1xf32>
    %89 = arith.addf %85, %88 : vector<16x1xf32>
    %90 = math.rsqrt %89 : vector<16x1xf32>
    %91 = vector.broadcast %90 : vector<16x1xf32> to vector<16x32xf32>
    %92 = arith.mulf %87, %91 : vector<16x32xf32>
    %93 = vector.broadcast %7 : vector<1x32xf32> to vector<16x32xf32>
    %94 = arith.mulf %92, %93 : vector<16x32xf32>
    %95 = vector.broadcast %8 : vector<1x32xf32> to vector<16x32xf32>
    %96 = arith.addf %94, %95 : vector<16x32xf32>
    %97 = arith.truncf %96 : vector<16x32xf32> to vector<16x32xbf16>
    %c0_41 = arith.constant 0 : index
    %c0_42 = arith.constant 0 : index
    %98 = vector.load %arg3[%c0_41, %c0_42] : memref<32x128xbf16, #tpu.memory_space<vmem>>, vector<32x128xbf16>
    %cst_43 = arith.constant dense<0.000000e+00> : vector<16x128xf32>
    %99 = tpu.matmul %97, %98, %cst_43 {dimension_numbers = #tpu.dot_dimension_numbers<[1], [0], [0], [1], [0, 0, 1, 1], [], []>} : vector<16x32xbf16>, vector<32x128xbf16>, vector<16x128xf32> -> vector<16x128xf32>
    %100 = vector.broadcast %9 : vector<1x128xf32> to vector<16x128xf32>
    %101 = arith.addf %99, %100 : vector<16x128xf32>
    %102 = vector.broadcast %0 : vector<16x1xf32> to vector<16x128xf32>
    %103 = arith.mulf %101, %102 : vector<16x128xf32>
    %c0_44 = arith.constant 0 : index
    %c0_45 = arith.constant 0 : index
    %104 = vector.load %arg5[%c0_44, %c0_45] : memref<16x128xf32, #tpu.memory_space<vmem>>, vector<16x128xf32>
    tpu.vector_store %arg5[%c0_44, %c0_45], %103 {strides = array<i32>} : memref<16x128xf32, #tpu.memory_space<vmem>>, vector<16x128xf32>,
    return
  }
}

</mosaic_0001>

<bundles_post_ra>
// kernel: squeeze.1
= control target key start
LH: loop header
LB: loop body
LE: loop exit
PB: predicated region body
PF: predicated region fallthrough
CT: control target
= control target key end

     0   :  { %s85_s0 = inlined_call_operand.vmem [shape: f32[16], index: 0, kind: input, shape index: {}]   ;;  %s86_s1 = inlined_call_operand.hbm [shape: f32[2,8], index: 1, kind: output, shape index: {}]  }
   0x1   :  { %v5_v0 = vld [vmem:[%s85_s0] sm:$0x1] }
   0x2   :  { %2 = vsyncpa [#allocation1], 0  ;;  %6 = vst [vmem:[#allocation3] sm:$0x1] %v5_v0  ;;  %vm8_vm0 = vcmask 64512   ;;  %s58_s0 = smov 120  }
   0x3   :  { %s59_s8 = smov [#allocation0]  }
   0x4   :  { %s26_s9 = sshll.u32 %s59_s8, 4  ;;  %s27_s9 = int_to_ptr.vmem [resolvable:$true] %s26_s9 }
   0x5   :  { %s34_s10 = scalar_lea.vmem %s27_s9, 32  ;;  %p39_p1 = scmp.lt.s32.totalorder %s27_s9, %s27_s9 }
   0x6   :  { %p35_p0 = scmp.ne.s32.totalorder %s27_s9, %s34_s10  ;;  %p40_p2 = scmp.lt.s32.totalorder %s34_s10, %s34_s10 }
   0x8   :  { %p41_p3 = por %p40_p2, %p39_p1 }
   0x9   :  { %v10_v1 = vld [vmem:[#allocation3] sm:$0x1]  }
   0xa   :  { %v7_v2 = vld [vmem:[#allocation3] sm:$0x1]   ;;  %11 = vrot.lane.b32.xlu0 %v10_v1, %s58_s0  ;;  %p42_p4 = pnand %p41_p3, %p35_p0 }
   0xb   :  { %9 = vst.msk [vmem:[#allocation2] sm:$0x1] %vm8_vm0, %v7_v2  }
  0x7c   :  { %v12_v3 = vpop.permute.xlu0 %11  }
  0x7d   :  { %15 = vst.msk [vmem:[#allocation2 + $0x1] sm:$0x1] %vm8_vm0, %v12_v3  }
  0x84   :  { %v19_v4 = vld [vmem:[#allocation2] sm:$0x3] }
  0x85   :  { %21 = vst [vmem:[#allocation0] sm:$0x3] %v19_v4 }
  0x86   :  { %45 = shalt.err (!%p42_p4)
}
  0x87   :  { %s46_s13 = scalar_lea.hbm %s86_s1, 32 }
  0x88   :  { %p47_p5 = scmp.ne.s32.totalorder %s86_s1, %s46_s13  ;;  %p50_p6 = scmp.lt.u32.totalorder %s46_s13, %s86_s1 }
  0x8a   :  { %p52_p7 = pnand %p50_p6, %p47_p5 }
  0x8c   :  { %55 = shalt.err (!%p52_p7)
}
  0x8d   :  { %29 = dma.vmem_to_hbm [thread:$0]  %s27_s9, 32, %s86_s1, [#allocation1]  }
  0x8e   :  { %56 = dma.done.wait [#allocation1], 32  }
  0x8f   :  { %57 = vsyncadd [#allocation1], 4294967264 }
  0x90   :  { %31 = vsyncpa [#allocation1], 1 }

// kernel: variance_predictor.1
= control target key start
LH: loop header
LB: loop body
LE: loop exit
PB: predicated region body
PF: predicated region fallthrough
CT: control target
= control target key end

     0   :  { %v759_v0 = vmov 2   ;;  %v760_v1 = vmov 1   ;;  %v34_v4 = vlaneseq  ;;  %v761_v6 = vmov 0.0   ;;  %s964_s1 = inlined_call_operand.vmem [shape: f32[16,3], index: 1, kind: input, shape index: {}]   ;;  %s965_s2 = inlined_call_operand.vmem [shape: bf16[192,32], index: 2, kind: input, shape index: {}]   ;;  %s966_s0 = inlined_call_operand.vmem [shape: f32[16,32], index: 0, kind: input, shape index: {}]   ;;  %s967_s4 = inlined_call_operand.vmem [shape: f32[8,128], index: 4, kind: input, shape index: {}]   ;;  %s968_s3 = inlined_call_operand.vmem [shape: bf16[32,128], index: 3, kind: input, shape index: {}]   ;;  %s969_s5 = inlined_call_operand.vmem [shape: f32[16,128], index: 5, kind: output, shape index: {}]  }
   0x1   :  { %734 = vset.pattern.permute.xlu1 %v759_v0  ;;  %733 = vset.pattern.permute.xlu0 %v760_v1  ;;  %v797_v2 = vld [vmem:[%s964_s1] sm:$0xff]  ;;  %v802_v3 = vld [vmem:[%s964_s1 + $0x8] sm:$0xff]  ;;  %v737_v5 = vld [vmem:[%s965_s2 + $0x10] sm:$0xff]   ;;  %vm762_vm0 = vmmov 0   ;;  %vm92_vm3 = vcmask 261120  }
   0x2   :  { %57 = vperm.xlu1 %734, %v797_v2   ;;  %41 = vperm.xlu0 %733, %v797_v2   ;;  %v738_v7 = vld [vmem:[%s965_s2 + $0x18] sm:$0xff]   ;;  %v815_v8 = vshrl.u32 %v34_v4, 7  ;;  %v30_v9 = vld [vmem:[%s966_s0] sm:$0xff]  ;;  %v31_v10 = vld [vmem:[%s966_s0 + $0x8] sm:$0xff] }
   0x3   :  { %672 = vmatprep.subr.bf16.mxu0 %v761_v6  ;;  %676 = vmatprep.mubr.msk.bf16.mxu0 %vm762_vm0, %v761_v6  ;;  %v51_v11 = vrot.slane %v30_v9, 1  ;;  %v32_v12 = vrot.slane %v30_v9, 7  ;;  %v739_v13 = vld [vmem:[%s965_s2] sm:$0xff]   ;;  %v52_v14 = vrot.slane %v31_v10, 1  ;;  %v33_v15 = vrot.slane %v31_v10, 7  ;;  %v741_v21 = vld [vmem:[%s965_s2 + $0x8] sm:$0xff]  }
   0x4   :  { %673 = vmatpush3.bf16.msra.mxu0 %v737_v5  ;;  %680 = vmatprep.subr.bf16.mxu1 %v761_v6  ;;  %vm53_vm1 = vcmp.lt.s32.totalorder %v815_v8, 7  ;;  %vm36_vm2 = vcmp.lt.s32.totalorder %v815_v8, 1  ;;  %v79_v16 = vpack.c.bf16 %v31_v10, %v30_v9  ;;  %v740_v22 = vld [vmem:[%s965_s2 + $0x20] sm:$0xff]   ;;  %v742_v23 = vld [vmem:[%s965_s2 + $0x28] sm:$0xff]   ;;  %v745_v9 = vld [vmem:[%s965_s2 + $0x30] sm:$0xff]  }
   0x5   :  { %674 = vmatprep.subr.bf16.mxu0 %v761_v6  ;;  %684 = vmatprep.mubr.msk.bf16.mxu1 %vm762_vm0, %v761_v6  ;;  %v54_v17 = vsel %vm53_vm1, %v51_v11, %v52_v14  ;;  %v38_v18 = vsel %vm36_vm2, %v33_v15, %v32_v12  ;;  %v55_v19 = vsel %vm53_vm1, %v52_v14, %v51_v11  ;;  %v632_v43 = vld [vmem:[%s967_s4] ss:$0 sm:$0xff]  ;;  %v747_v10 = vld [vmem:[%s965_s2 + $0x38] sm:$0xff]  }
   0x6   :  { %61 = vperm.xlu1 %734, %v802_v3   ;;  %46 = vperm.xlu0 %733, %v802_v3   ;;  %v37_v20 = vsel %vm36_vm2, %v32_v12, %v33_v15  ;;  %v743_v5 = vld [vmem:[%s965_s2 + $0x40] sm:$0xff]  }
   0x7   :  { %681 = vmatpush3.bf16.msra.mxu1 %v739_v13 }
   0x8   :  { %675 = vmatpush3.bf16.msra.mxu0 %v738_v7  ;;  %682 = vmatprep.subr.bf16.mxu1 %v761_v6  ;;  %v744_v7 = vld [vmem:[%s965_s2 + $0x48] sm:$0xff]  }
   0x9   :  { %688 = vmatprep.subr.bf16.mxu0 %v761_v6 }
   0xb   :  { %677 = vmatmul.mubr.msk.bf16.vlgmr.msra.gmra.mrb[0].mxu0 %vm92_vm3, %v79_v16  ;;  %683 = vmatpush3.bf16.msra.mxu1 %v741_v21  ;;  %v634_v21 = vld [vmem:[%s967_s4 + $0x2] ss:$0 sm:$0xff] }
   0xc   :  { %689 = vmatpush3.bf16.msra.mxu0 %v740_v22  ;;  %692 = vmatprep.mubr.msk.bf16.mxu0 %vm762_vm0, %v761_v6 }
   0xd   :  { %690 = vmatprep.subr.bf16.mxu0 %v761_v6  ;;  %696 = vmatprep.subr.bf16.mxu1 %v761_v6 }
  0x10   :  { %691 = vmatpush3.bf16.msra.mxu0 %v742_v23 }
  0x11   :  { %704 = vmatprep.subr.bf16.mxu0 %v761_v6 }
  0x81   :  { %v859_v24 = vpop.permute.xlu1 %57  ;;  %v861_v25 = vpop.permute.xlu0 %41 }
  0x82   :  { %v64_v28 = vmul.f32 %v859_v24, %v54_v17  ;;  %v49_v29 = vmul.f32 %v861_v25, %v38_v18  ;;  %v633_v18 = vld [vmem:[%s967_s4 + $0x1] ss:$0 sm:$0xff] }
  0x85   :  { %v863_v26 = vpop.permute.xlu1 %61  ;;  %v865_v27 = vpop.permute.xlu0 %46 }
  0x86   :  { %v65_v30 = vmul.f32 %v863_v26, %v55_v19  ;;  %v50_v31 = vmul.f32 %v865_v27, %v37_v20 }
  0x88   :  { %v193_v32 = vpack.c.bf16 %v65_v30, %v64_v28  ;;  %v78_v33 = vpack.c.bf16 %v50_v31, %v49_v29  ;;  %v746_v31 = vld [vmem:[%s965_s2 + $0x50] sm:$0xff]  }
  0x8a   :  { %685 = vmatmul.mubr.msk.bf16.vlgmr.msra.gmra.mrb[0].mxu1 %vm92_vm3, %v78_v33  ;;  %693 = vmatmul.mubr.msk.bf16.vlgmr.msra.gmra.mrb[4].mxu0 %vm92_vm3, %v193_v32 }
  0x8b   :  { %700 = vmatprep.mubr.msk.bf16.mxu1 %vm762_vm0, %v761_v6  ;;  %708 = vmatprep.mubr.msk.bf16.mxu0 %vm762_vm0, %v761_v6 }
  0x8c   :  { %697 = vmatpush3.bf16.msra.mxu1 %v743_v5  ;;  %705 = vmatpush3.bf16.msra.mxu0 %v745_v9 }
  0x8d   :  { %698 = vmatprep.subr.bf16.mxu1 %v761_v6  ;;  %706 = vmatprep.subr.bf16.mxu0 %v761_v6 }
  0x90   :  { %699 = vmatpush3.bf16.msra.mxu1 %v744_v7  ;;  %707 = vmatpush3.bf16.msra.mxu0 %v747_v10 }
  0x91   :  { %712 = vmatprep.subr.bf16.mxu1 %v761_v6  ;;  %720 = vmatprep.subr.bf16.mxu0 %v761_v6 }
  0xde   :  { %v130_v34 = vpop.f32.mrb[0].mxu0 }
  0xdf   :  { %v678_v35 = vpop.f32.mrb[1].mxu0 }
  0xe0   :  { %v133_v36 = vpop.f32.mrb[2].mxu0 }
  0xe1   :  { %v679_v37 = vpop.f32.mrb[3].mxu0 }
 0x15d   :  { %v186_v38 = vpop.f32.mrb[0].mxu1  ;;  %v243_v39 = vpop.f32.mrb[4].mxu0 }
 0x15e   :  { %v187_v40 = vadd.f32 %v186_v38, %v130_v34  ;;  %v686_v41 = vpop.f32.mrb[1].mxu1  ;;  %v694_v42 = vpop.f32.mrb[5].mxu0 }
 0x15f   :  { %v189_v44 = vpop.f32.mrb[2].mxu1  ;;  %v246_v45 = vpop.f32.mrb[6].mxu0  ;;  %v748_v41 = vld [vmem:[%s965_s2 + $0x58] sm:$0xff]  }
 0x160   :  { %v250_v46 = vadd.f32 %v243_v39, %v187_v40  ;;  %v190_v47 = vadd.f32 %v189_v44, %v133_v36  ;;  %v687_v48 = vpop.f32.mrb[3].mxu1  ;;  %v695_v49 = vpop.f32.mrb[7].mxu0 }
 0x162   :  { %v256_v50 = vadd.f32 %v632_v43, %v250_v46  ;;  %v251_v51 = vadd.f32 %v246_v45, %v190_v47 }
 0x164   :  { %v257_v52 = vadd.f32 %v632_v43, %v251_v51  ;;  %v258_v53 = vmax.f32 %v256_v50, 0.0 }
 0x166   :  { %v260_v54 = vsel %vm92_vm3, %v258_v53, 0.0  ;;  %v259_v55 = vmax.f32 %v257_v52, 0.0 }
 0x167   :  { %261 = vadd.xlane.f32.xlu0 %v260_v54 }
 0x168   :  { %v263_v56 = vsel %vm92_vm3, %v259_v55, 0.0 }
 0x169   :  { %264 = vadd.xlane.f32.xlu1 %v263_v56 }
 0x1f4   :  { %v262_v57 = vpop.xlane.xlu0 %261 }
 0x1f5   :  { %v267_v58 = vmul.f32 0.03125, %v262_v57 }
 0x1f6   :  { %v265_v59 = vpop.xlane.xlu1 %264 }
 0x1f7   :  { %v269_v60 = vsub.f32 %v258_v53, %v267_v58  ;;  %v268_v61 = vmul.f32 0.03125, %v265_v59  ;;  %v644_v53 = vld [vmem:[%s967_s4 + $0x3] ss:$0 sm:$0xff] }
 0x1f9   :  { %v270_v62 = vsub.f32 %v259_v55, %v268_v61  ;;  %v271_v63 = vmul.f32 %v269_v60, %v269_v60 }
 0x1fb   :  { %v273_v0 = vsel %vm92_vm3, %v271_v63, 0.0  ;;  %v272_v1 = vmul.f32 %v270_v62, %v270_v62 }
 0x1fc   :  { %274 = vadd.xlane.f32.xlu0 %v273_v0 }
 0x1fd   :  { %v276_v4 = vsel %vm92_vm3, %v272_v1, 0.0 }
 0x200   :  { %277 = vadd.xlane.f32.xlu0 %v276_v4 }
 0x289   :  { %v275_v11 = vpop.xlane.xlu0 %274 }
 0x28a   :  { %v279_v12 = vmul.f32 0.03125, %v275_v11 }
 0x28c   :  { %v281_v13 = vadd.f32 1e-05, %v279_v12 }
 0x28d   :  { %v278_v14 = vpop.xlane.xlu0 %277 }
 0x28e   :  { %751 = vrsqrt.f32 %v281_v13  ;;  %v280_v15 = vmul.f32 0.03125, %v278_v14 }
 0x290   :  { %v282_v16 = vadd.f32 1e-05, %v280_v15 }
 0x292   :  { %753 = vrsqrt.f32 %v282_v16  ;;  %v749_v16 = vld [vmem:[%s968_s3] sm:$0xff]  }
 0x298   :  { %v752_v17 = vpop.eup %751 }
 0x299   :  { %v285_v19 = vmul.f32 %v752_v17, %v269_v60  ;;  %v750_v17 = vld [vmem:[%s968_s3 + $0x8] sm:$0xff]  }
 0x29b   :  { %v291_v20 = vmul.f32 %v633_v18, %v285_v19 }
 0x29c   :  { %v754_v22 = vpop.eup %753 }
 0x29d   :  { %v286_v23 = vmul.f32 %v754_v22, %v270_v62  ;;  %v297_v28 = vadd.f32 %v634_v21, %v291_v20 }
 0x29f   :  { %v292_v29 = vmul.f32 %v633_v18, %v286_v23  ;;  %v299_v32 = vrot.slane %v297_v28, 7  ;;  %v305_v35 = vrot.slane %v297_v28, 1  ;;  %v763_v18 = vmov 0  }
 0x2a0   :  { %735 = vset.pattern.permute.xlu1 %v763_v18  ;;  %736 = vset.pattern.permute.xlu0 %v763_v18 }
 0x2a1   :  { %v298_v30 = vadd.f32 %v634_v21, %v292_v29 }
 0x2a3   :  { %v324_v33 = vpack.c.bf16 %v298_v30, %v297_v28  ;;  %v300_v34 = vrot.slane %v298_v30, 7  ;;  %v306_v36 = vrot.slane %v298_v30, 1 }
 0x2a5   :  { %701 = vmatmul.mubr.msk.bf16.vlgmr.msra.gmra.mrb[4].mxu1 %vm92_vm3, %v324_v33  ;;  %v301_v37 = vsel %vm36_vm2, %v299_v32, %v300_v34  ;;  %v302_v38 = vsel %vm36_vm2, %v300_v34, %v299_v32  ;;  %v307_v39 = vsel %vm53_vm1, %v305_v35, %v306_v36  ;;  %v308_v40 = vsel %vm53_vm1, %v306_v36, %v305_v35 }
 0x2a6   :  { %713 = vmatpush3.bf16.msra.mxu1 %v746_v31  ;;  %v303_v42 = vmul.f32 %v302_v38, %v861_v25  ;;  %v304_v43 = vmul.f32 %v301_v37, %v865_v27  ;;  %716 = vmatprep.mubr.msk.bf16.mxu1 %vm762_vm0, %v761_v6  ;;  %v309_v44 = vmul.f32 %v307_v39, %v859_v24  ;;  %v647_v37 = vld [vmem:[%s967_s4 + $0x7] ss:$0 sm:$0xff] }
 0x2a7   :  { %714 = vmatprep.subr.bf16.mxu1 %v761_v6  ;;  %v310_v45 = vmul.f32 %v308_v40, %v863_v26 }
 0x2a8   :  { %v323_v8 = vpack.c.bf16 %v304_v43, %v303_v42 }
 0x2a9   :  { %v437_v46 = vpack.c.bf16 %v310_v45, %v309_v44 }
 0x2aa   :  { %715 = vmatpush3.bf16.msra.mxu1 %v748_v41  ;;  %709 = vmatmul.mubr.msk.bf16.vlgmr.msra.gmra.mrb[8].mxu0 %vm92_vm3, %v323_v8 }
 0x2ab   :  { %724 = vmatprep.mubr.msk.bf16.mxu0 %vm762_vm0, %v761_v6  ;;  %721 = vmatpush3.bf16.msra.mxu0 %v749_v16 }
 0x2ac   :  { %722 = vmatprep.subr.bf16.mxu0 %v761_v6  ;;  %v645_v6 = vld [vmem:[%s967_s4 + $0x4] ss:$0 sm:$0xff] }
 0x2ad   :  { %717 = vmatmul.mubr.msk.bf16.vlgmr.msra.gmra.mrb[8].mxu1 %vm92_vm3, %v437_v46 }
 0x2af   :  { %723 = vmatpush3.bf16.msra.mxu0 %v750_v17 }
 0x378   :  { %v374_v25 = vpop.f32.mrb[4].mxu1 }
 0x379   :  { %v702_v27 = vpop.f32.mrb[5].mxu1 }
 0x37a   :  { %v377_v47 = vpop.f32.mrb[6].mxu1 }
 0x37b   :  { %v703_v48 = vpop.f32.mrb[7].mxu1 }
 0x37d   :  { %v430_v49 = vpop.f32.mrb[8].mxu0 }
 0x37e   :  { %v431_v50 = vadd.f32 %v430_v49, %v374_v25  ;;  %v710_v51 = vpop.f32.mrb[9].mxu0 }
 0x37f   :  { %v433_v24 = vpop.f32.mrb[10].mxu0 }
 0x380   :  { %v434_v52 = vadd.f32 %v433_v24, %v377_v47  ;;  %v711_v26 = vpop.f32.mrb[11].mxu0  ;;  %v487_v54 = vpop.f32.mrb[8].mxu1 }
 0x381   :  { %v494_v55 = vadd.f32 %v487_v54, %v431_v50  ;;  %v718_v56 = vpop.f32.mrb[9].mxu1 }
 0x382   :  { %v490_v57 = vpop.f32.mrb[10].mxu1 }
 0x383   :  { %v500_v58 = vadd.f32 %v644_v53, %v494_v55  ;;  %v495_v59 = vadd.f32 %v490_v57, %v434_v52  ;;  %v719_v60 = vpop.f32.mrb[11].mxu1 }
 0x385   :  { %v501_v61 = vadd.f32 %v644_v53, %v495_v59  ;;  %v502_v62 = vmax.f32 %v500_v58, 0.0 }
 0x387   :  { %v504_v63 = vsel %vm92_vm3, %v502_v62, 0.0  ;;  %v503_v0 = vmax.f32 %v501_v61, 0.0 }
 0x388   :  { %505 = vadd.xlane.f32.xlu1 %v504_v63 }
 0x389   :  { %v507_v1 = vsel %vm92_vm3, %v503_v0, 0.0 }
 0x38a   :  { %508 = vadd.xlane.f32.xlu0 %v507_v1 }
 0x415   :  { %v506_v4 = vpop.xlane.xlu1 %505 }
 0x416   :  { %v510_v5 = vmul.f32 0.03125, %v506_v4 }
 0x417   :  { %v509_v7 = vpop.xlane.xlu0 %508 }
 0x418   :  { %v512_v9 = vsub.f32 %v502_v62, %v510_v5  ;;  %v511_v10 = vmul.f32 0.03125, %v509_v7 }
 0x41a   :  { %v513_v11 = vsub.f32 %v503_v0, %v511_v10  ;;  %v514_v12 = vmul.f32 %v512_v9, %v512_v9 }
 0x41c   :  { %v516_v13 = vsel %vm92_vm3, %v514_v12, 0.0  ;;  %v515_v14 = vmul.f32 %v513_v11, %v513_v11 }
 0x41d   :  { %517 = vadd.xlane.f32.xlu1 %v516_v13 }
 0x41e   :  { %v519_v15 = vsel %vm92_vm3, %v515_v14, 0.0 }
 0x41f   :  { %520 = vadd.xlane.f32.xlu0 %v519_v15 }
 0x42e   :  { %608 = vperm.xlu1 %735, %v797_v2   ;;  %v646_v2 = vld [vmem:[%s967_s4 + $0x5] ss:$0 sm:$0xff] }
 0x435   :  { %612 = vperm.xlu0 %736, %v802_v3  }
 0x4aa   :  { %v518_v19 = vpop.xlane.xlu1 %517 }
 0x4ab   :  { %v522_v20 = vmul.f32 0.03125, %v518_v19 }
 0x4ac   :  { %v521_v21 = vpop.xlane.xlu0 %520 }
 0x4ad   :  { %v524_v22 = vadd.f32 1e-05, %v522_v20  ;;  %v523_v23 = vmul.f32 0.03125, %v521_v21 }
 0x4ae   :  { %v609_v39 = vpop.permute.xlu1 %608 }
 0x4af   :  { %755 = vrsqrt.f32 %v524_v22  ;;  %v525_v28 = vadd.f32 1e-05, %v523_v23 }
 0x4b1   :  { %757 = vrsqrt.f32 %v525_v28 }
 0x4b4   :  { %v613_v43 = vpop.permute.xlu0 %612 }
 0x4b9   :  { %v756_v29 = vpop.eup %755 }
 0x4ba   :  { %v528_v30 = vmul.f32 %v756_v29, %v512_v9 }
 0x4bb   :  { %v758_v31 = vpop.eup %757 }
 0x4bc   :  { %v534_v32 = vmul.f32 %v645_v6, %v528_v30  ;;  %v529_v33 = vmul.f32 %v758_v31, %v513_v11 }
 0x4be   :  { %v535_v3 = vmul.f32 %v645_v6, %v529_v33  ;;  %v540_v34 = vadd.f32 %v646_v2, %v534_v32 }
 0x4c0   :  { %v541_v35 = vadd.f32 %v646_v2, %v535_v3 }
 0x4c2   :  { %v542_v36 = vpack.c.bf16 %v541_v35, %v540_v34 }
 0x4c4   :  { %725 = vmatmul.mubr.msk.bf16.vlgmr.msra.gmra.mrb[12].mxu0 %vm92_vm3, %v542_v36 }
 0x597   :  { %v600_v38 = vpop.f32.mrb[12].mxu0 }
 0x598   :  { %v601_v40 = vadd.f32 %v647_v37, %v600_v38  ;;  %v726_v41 = vpop.f32.mrb[13].mxu0 }
 0x599   :  { %v603_v42 = vpop.f32.mrb[14].mxu0 }
 0x59a   :  { %v615_v44 = vmul.f32 %v609_v39, %v601_v40  ;;  %v604_v45 = vadd.f32 %v647_v37, %v603_v42  ;;  %v727_v8 = vpop.f32.mrb[15].mxu0 }
 0x59c   :  { %617 = vst [vmem:[%s969_s5] sm:$0xff] %v615_v44  ;;  %v616_v46 = vmul.f32 %v613_v43, %v604_v45 }
 0x59e   :  { %618 = vst [vmem:[%s969_s5 + $0x8] sm:$0xff] %v616_v46 }

</bundles_post_ra>
